<compile_context>
chip_gen: v5e
topology: v5e:2x2
jax: 0.10.0
libtpu: 0.0.40
codegen_flags: <defaults>
</compile_context>

<pallas_src>
import jax
import jax.numpy as jnp
import numpy as np
from jax.experimental import pallas as pl
from jax.experimental.pallas import tpu as pltpu

_TM_MAX = 256     # row-tile cap (MXU stationary dim on v6e/v7x)
_TN_MAX = 1024    # vocab-tile cap (keeps double-buffered W tiles small on v5e/v7x)


def _round_up(x, m):
    return ((x + m - 1) // m) * m


# --------------------------------------------------------------------------- #
# Stage 1: x[b, s, :] = tok_table[ids[b, s], :] + pos_table[s, :]   (bf16 out)
# --------------------------------------------------------------------------- #
def embed_gather_kernel(ids_smem, tok_hbm, pos_ref, x_ref, gbuf, sems):
    """One batch element per grid step: S row-gather DMAs + one (S, E) store.

    ids_smem : (B, S) int32 in SMEM (scalar prefetch)
    tok_hbm  : (V, E) token table, left in HBM (memory_space=pl.ANY)
    pos_ref  : (C, E) positional table, VMEM-resident (constant index_map)
    x_ref    : (1, S, E) bf16 output block
    gbuf     : (S, E) f32 VMEM scratch (gather landing buffer)
    sems     : (S,) DMA semaphores
    """
    b = pl.program_id(0)
    S = gbuf.shape[0]

    def row_copy(s):
        row = ids_smem[b, s]
        return pltpu.make_async_copy(
            tok_hbm.at[pl.ds(row, 1), :], gbuf.at[pl.ds(s, 1), :], sems.at[s])

    @pl.loop(0, S)
    def _start(s):          # issue all S gather DMAs (kept in flight together)
        row_copy(s).start()

    @pl.loop(0, S)
    def _wait(s):
        row_copy(s).wait()

    # Dropout (eval) / DummyTransformerBlock / DummyLayerNorm are identities.
    # TODO(synk): training-mode dropout (drop_rate > 0) is not implemented.
    x_ref[0] = (gbuf[...] + pos_ref[:S, :]).astype(x_ref.dtype)


# --------------------------------------------------------------------------- #
# Stage 2: logits = x @ W_t + b        (x bf16, W_t bf16, f32 accumulation)
# --------------------------------------------------------------------------- #
def proj_kernel(x_ref, w_ref, b_ref, o_ref):
    acc = jnp.dot(x_ref[...], w_ref[...], preferred_element_type=jnp.float32)
    o_ref[...] = acc + b_ref[...]


# --------------------------------------------------------------------------- #
# Wrapper
# --------------------------------------------------------------------------- #
def prepare_params(tok_table, pos_table, w_proj, b_proj):
    """One-time (parameter-load-time) prep: transpose / pad / cast the projection.

    w_proj: (V, E) as in nn.Linear(emb_dim, vocab_size).weight  ->  (E, V_pad) bf16
    b_proj: (V,)                                                ->  (1, V_pad) f32
    """
    V, E = w_proj.shape
    tn = min(_TN_MAX, _round_up(V, 128))
    v_pad = _round_up(V, tn)
    w_t = jnp.swapaxes(w_proj, 0, 1).astype(jnp.bfloat16)          # (E, V)
    b = b_proj.astype(jnp.float32)
    if v_pad != V:
        w_t = jnp.pad(w_t, ((0, 0), (0, v_pad - V)))
        b = jnp.pad(b, (0, v_pad - V))
    return dict(
        tok_table=tok_table.astype(jnp.float32),
        pos_table=pos_table.astype(jnp.float32),
        w_t=w_t,                        # (E, V_pad) bf16, MXU-native layout
        b2=b.reshape(1, v_pad),         # (1, V_pad) f32
        vocab_size=V,
        tn=tn,
    )


def dummy_gpt_forward(in_idx, params):
    """in_idx: (B, S) int. Returns logits (B, S, vocab_size) float32."""
    tok = params["tok_table"]
    pos = params["pos_table"]
    w_t = params["w_t"]
    b2 = params["b2"]
    V = params["vocab_size"]
    TN = params["tn"]

    B, S = in_idx.shape
    Vtab, E = tok.shape
    C = pos.shape[0]
    assert S <= C, f"seq_len {S} exceeds context_length {C}"
    bs = B * S
    V_pad = w_t.shape[1]

    # NOTE: clamping silently remaps out-of-range ids (PyTorch's embedding would
    # raise); kept so a bad id can never become an unchecked OOB row DMA.
    ids = jnp.clip(in_idx.astype(jnp.int32), 0, Vtab - 1)

    # ---- Stage 1: batched embedding gather (S rows per grid step) ----
    x3 = pl.pallas_call(
        embed_gather_kernel,
        out_shape=jax.ShapeDtypeStruct((B, S, E), jnp.bfloat16),
        grid_spec=pltpu.PrefetchScalarGridSpec(
            num_scalar_prefetch=1,                               # ids -> SMEM
            grid=(B,),
            in_specs=[
                pl.BlockSpec(memory_space=pl.ANY),               # token table stays in HBM
                pl.BlockSpec((C, E), lambda b, ids_ref: (0, 0)), # pos table VMEM-resident
            ],
            out_specs=pl.BlockSpec((1, S, E), lambda b, ids_ref: (b, 0, 0)),
            scratch_shapes=[
                pltpu.VMEM((S, E), tok.dtype),
                pltpu.SemaphoreType.DMA((S,)),
            ],
        ),
        compiler_params=pltpu.CompilerParams(dimension_semantics=("parallel",)),
    )(ids, tok, pos)
    x = x3.reshape(bs, E)

    # ---- Stage 2: logits = x @ W_t + b, weight streamed exactly once ----
    TM = min(_TM_MAX, _round_up(bs, 8))
    bs_pad = _round_up(bs, TM)
    if bs_pad != bs:
        x = jnp.pad(x, ((0, bs_pad - bs), (0, 0)))

    # Double-buffered tile working set -> explicit, generation-aware VMEM limit.
    tile_bytes = 2 * (TM * E * 2 + E * TN * 2 + TM * TN * 4 + TN * 4)
    vmem_limit = int(min(max(4 * tile_bytes, 32 << 20), 56 << 20))

    logits_pad = pl.pallas_call(
        proj_kernel,
        out_shape=jax.ShapeDtypeStruct((bs_pad, V_pad), jnp.float32),
        grid=(V_pad // TN, bs_pad // TM),                 # vocab OUTER: W tiles DMA'd once
        in_specs=[
            pl.BlockSpec((TM, E), lambda j, i: (i, 0)),   # small x re-streamed
            pl.BlockSpec((E, TN), lambda j, i: (0, j)),   # native (E, V) layout, no XLU transpose
            pl.BlockSpec((1, TN), lambda j, i: (0, j)),   # bias tile, re-fetched only per vocab tile
        ],
        out_specs=pl.BlockSpec((TM, TN), lambda j, i: (i, j)),
        compiler_params=pltpu.CompilerParams(
            dimension_semantics=("parallel", "parallel"),
            vmem_limit_bytes=vmem_limit),
    )(x, w_t, b2)

    return logits_pad[:bs, :V].reshape(B, S, V)


if __name__ == "__main__":
    config = dict(vocab_size=256, emb_dim=128, context_length=16,
                  drop_rate=0.0, n_layers=2)
    B, S = 2, 8

    key = jax.random.PRNGKey(0)
    k_tok, k_pos, k_w, k_b, k_idx = jax.random.split(key, 5)

    tok_table = jax.random.normal(
        k_tok, (config["vocab_size"], config["emb_dim"]), dtype=jnp.float32) * 0.02
    pos_table = jax.random.normal(
        k_pos, (config["context_length"], config["emb_dim"]), dtype=jnp.float32) * 0.02
    # nn.Linear(emb_dim, vocab_size): weight (vocab, emb), bias (vocab,)
    w_proj = jax.random.normal(
        k_w, (config["vocab_size"], config["emb_dim"]), dtype=jnp.float32) * 0.02
    b_proj = jax.random.normal(
        k_b, (config["vocab_size"],), dtype=jnp.float32) * 0.02

    in_idx = jax.random.randint(k_idx, (B, S), 0, config["vocab_size"],
                                dtype=jnp.int32)

    params = prepare_params(tok_table, pos_table, w_proj, b_proj)
    logits = dummy_gpt_forward(in_idx, params)
    logits = jax.block_until_ready(logits)

    # Pure-JAX f32 reference (dropout/blocks/norm are identities). Tolerances
    # account for the bf16 weight/activation streaming (accumulation is f32).
    x_ref = tok_table[in_idx] + pos_table[jnp.arange(S)][None, :, :]
    ref = x_ref @ w_proj.T + b_proj
    np.testing.assert_allclose(np.asarray(logits), np.asarray(ref),
                               rtol=2e-2, atol=1e-3)

    print("KERNEL_OK")
</pallas_src>

<mosaic_0001>
module attributes {stable_mosaic.version = 11 : i64} {
  func.func @embed_gather_kernel(%arg0: i32, %arg1: memref<2x8xi32, #tpu.memory_space<smem>>, %arg2: memref<256x128xf32, #tpu.memory_space<any>>, %arg3: memref<16x128xf32, #tpu.memory_space<vmem>>, %arg4: memref<1x8x128xbf16, #tpu.memory_space<vmem>>, %arg5: memref<8x128xf32, #tpu.memory_space<vmem>>, %arg6: memref<8x!tpu.dma_semaphore, #tpu.memory_space<semaphore_mem>>) attributes {dimension_semantics = [#tpu.dimension_semantics<parallel>], iteration_bounds = array<i64: 2>, scalar_prefetch = 1 : i64, scratch_operands = 2 : i64, tpu.core_type = #tpu.core_type<tc>, window_params = [{}, {pipeline_mode = #tpu.pipeline_mode<synchronous>, transform_indices = @transform_1, window_bounds = array<i64: 16, 128>}, {transform_indices = @transform_2, window_bounds = array<i64: 1, 8, 128>}]} {
    %c0_i32 = arith.constant 0 : i32
    %c8_i32 = arith.constant 8 : i32
    %0 = arith.addi %c0_i32, %c8_i32 : i32
    %c1_i32 = arith.constant 1 : i32
    scf.for %arg7 = %c0_i32 to %0 step %c1_i32  : i32 {
      %c1_i32_11 = arith.constant 1 : i32
      %9 = arith.muli %arg7, %c1_i32_11 : i32
      %c0_i32_12 = arith.constant 0 : i32
      %10 = arith.addi %c0_i32_12, %9 : i32
      %11 = arith.index_cast %arg0 : i32 to index
      %12 = arith.index_cast %10 : i32 to index
      %13 = memref.load %arg1[%11, %12] : memref<2x8xi32, #tpu.memory_space<smem>>
      %c0_i32_13 = arith.constant 0 : i32
      %14 = tpu.memref_slice %arg2[%13, %c0_i32_13] : memref<256x128xf32, #tpu.memory_space<any>> -> memref<1x128xf32, #tpu.memory_space<any>>
      %c0_i32_14 = arith.constant 0 : i32
      %15 = tpu.memref_slice %arg5[%10, %c0_i32_14] : memref<8x128xf32, #tpu.memory_space<vmem>> -> memref<1x128xf32, #tpu.memory_space<vmem>>
      %16 = tpu.memref_slice %arg6[%10] : memref<8x!tpu.dma_semaphore, #tpu.memory_space<semaphore_mem>> -> memref<1x!tpu.dma_semaphore, #tpu.memory_space<semaphore_mem>>
      %17 = tpu.memref_squeeze %16 : memref<1x!tpu.dma_semaphore, #tpu.memory_space<semaphore_mem>> -> memref<!tpu.dma_semaphore, #tpu.memory_space<semaphore_mem>>
      tpu.enqueue_dma source(%14 : memref<1x128xf32, #tpu.memory_space<any>>) target(%15 : memref<1x128xf32, #tpu.memory_space<vmem>>) target_semaphore(%17 : memref<!tpu.dma_semaphore, #tpu.memory_space<semaphore_mem>>)
    }
    %c8_i32_0 = arith.constant 8 : i32
    %c0_i32_1 = arith.constant 0 : i32
    %c8_i32_2 = arith.constant 8 : i32
    %1 = arith.addi %c0_i32_1, %c8_i32_2 : i32
    %c1_i32_3 = arith.constant 1 : i32
    scf.for %arg7 = %c0_i32_1 to %1 step %c1_i32_3  : i32 {
      %c1_i32_11 = arith.constant 1 : i32
      %9 = arith.muli %arg7, %c1_i32_11 : i32
      %c0_i32_12 = arith.constant 0 : i32
      %10 = arith.addi %c0_i32_12, %9 : i32
      %11 = arith.index_cast %arg0 : i32 to index
      %12 = arith.index_cast %10 : i32 to index
      %13 = memref.load %arg1[%11, %12] : memref<2x8xi32, #tpu.memory_space<smem>>
      %c0_i32_13 = arith.constant 0 : i32
      %14 = tpu.memref_slice %arg2[%13, %c0_i32_13] : memref<256x128xf32, #tpu.memory_space<any>> -> memref<1x128xf32, #tpu.memory_space<any>>
      %c0_i32_14 = arith.constant 0 : i32
      %15 = tpu.memref_slice %arg5[%10, %c0_i32_14] : memref<8x128xf32, #tpu.memory_space<vmem>> -> memref<1x128xf32, #tpu.memory_space<vmem>>
      %16 = tpu.memref_slice %arg6[%10] : memref<8x!tpu.dma_semaphore, #tpu.memory_space<semaphore_mem>> -> memref<1x!tpu.dma_semaphore, #tpu.memory_space<semaphore_mem>>
      %17 = tpu.memref_squeeze %16 : memref<1x!tpu.dma_semaphore, #tpu.memory_space<semaphore_mem>> -> memref<!tpu.dma_semaphore, #tpu.memory_space<semaphore_mem>>
      tpu.wait_dma2 semaphore(%17 : memref<!tpu.dma_semaphore, #tpu.memory_space<semaphore_mem>>) src(%14 : memref<1x128xf32, #tpu.memory_space<any>>) dst(%15 : memref<1x128xf32, #tpu.memory_space<vmem>>)
    }
    %c8_i32_4 = arith.constant 8 : i32
    %c0 = arith.constant 0 : index
    %c0_5 = arith.constant 0 : index
    %2 = vector.load %arg5[%c0, %c0_5] : memref<8x128xf32, #tpu.memory_space<vmem>>, vector<8x128xf32>
    %c0_6 = arith.constant 0 : index
    %c0_7 = arith.constant 0 : index
    %3 = vector.load %arg3[%c0_6, %c0_7] : memref<16x128xf32, #tpu.memory_space<vmem>>, vector<8x128xf32>
    %4 = arith.addf %2, %3 : vector<8x128xf32>
    %5 = arith.truncf %4 : vector<8x128xf32> to vector<8x128xbf16>
    %c0_8 = arith.constant 0 : index
    %c0_9 = arith.constant 0 : index
    %c0_10 = arith.constant 0 : index
    %6 = vector.load %arg4[%c0_8, %c0_9, %c0_10] : memref<1x8x128xbf16, #tpu.memory_space<vmem>>, vector<1x8x128xbf16>
    %7 = vector.shape_cast %6 : vector<1x8x128xbf16> to vector<8x128xbf16>
    %8 = vector.shape_cast %5 : vector<8x128xbf16> to vector<1x8x128xbf16>
    tpu.vector_store %arg4[%c0_8, %c0_9, %c0_10], %8 {strides = array<i32>} : memref<1x8x128xbf16, #tpu.memory_space<vmem>>, vector<1x8x128xbf16>,
    return
  }
  func.func @transform_1(%arg0: i32, %arg1: memref<2x8xi32, #tpu.memory_space<smem>>) -> (i32, i32) {
    %c0_i32 = arith.constant 0 : i32
    %c0_i32_0 = arith.constant 0 : i32
    %c0_i32_1 = arith.constant 0 : i32
    return %c0_i32, %c0_i32_0 : i32, i32
  }
  func.func @transform_2(%arg0: i32, %arg1: memref<2x8xi32, #tpu.memory_space<smem>>) -> (i32, i32, i32) {
    %c0_i32 = arith.constant 0 : i32
    %c0_i32_0 = arith.constant 0 : i32
    %c0_i32_1 = arith.constant 0 : i32
    return %arg0, %c0_i32, %c0_i32_0 : i32, i32, i32
  }
}

</mosaic_0001>

<bundles_post_ra>
// kernel: tpu_custom_call.1
= control target key start
LH: loop header
LB: loop body
LE: loop exit
PB: predicated region body
PF: predicated region fallthrough
CT: control target
= control target key end

     0   :  { %s561_s15 = smov [#allocation5]   ;;  %s715_s0 = inlined_call_operand.hbm [shape: s32[2,8], index: 0, kind: input, shape index: {}]   ;;  %s716_s1 = inlined_call_operand.hbm [shape: f32[256,128], index: 1, kind: input, shape index: {}]   ;;  %s717_s2 = inlined_call_operand.hbm [shape: f32[16,128], index: 2, kind: input, shape index: {}]   ;;  %s718_s3 = inlined_call_operand.hbm [shape: bf16[2,8,128], index: 3, kind: output, shape index: {}]  }
   0x1   :  { %s9_s14 = sshll.u32 %s715_s0, 4  ;;  %s10_s14 = int_to_ptr.hbm [resolvable:$true] %s9_s14 }
   0x2   :  { %12 = dma.hbm_to_smem %s10_s14, 32, %s561_s15, [#allocation4] }
   0x3   :  { %525 = dma.done.wait [#allocation4], 32 }
   0x4   :  { %526 = vsyncadd [#allocation4], 4294967264 }
   0x5   :  { %15 = sfence }
   0x6   :  { %16 = vsyncpa [#allocation7], 0 }
   0x7   :  { %17 = vsyncpa [#allocation8], 0 }
   0x8   :  { %19 = vsyncpa [#allocation8 + $0x1], 0  ;;  %s589_s16 = smov 0   ;;  %s591_s17 = smov 0  }
   0x9   :  { %s593_s18 = smov 0   ;;  %s595_s19 = smov 0  }
   0xa LB: > { %s610_s0 = sadd.s32 4294967295, %s551_s19   ;;  %s319_s20 = sadd.s32 4294967294, %s551_s19   ;;  %s551_s19 = sphi %s595_s19, %s724_s19   ;;  %s547_s18 = sphi %s593_s18, %s723_s18   ;;  %s543_s17 = sphi %s591_s17, %s722_s17   ;;  %s539_s16 = sphi %s589_s16, %s721_s16  }
   0xb   : > { %s614_s21 = sadd.s32 1, %s551_s19   ;;  %s53_s22 = sadd.s32 1, %s547_s18 }
   0xc   : > { %s50_s23 = ssub.s32 %s551_s19, %s614_s21  ;;  %p63_p0 = scmp.ne.s32.totalorder %s547_s18, %s543_s17 }
   0xd   : > { %p51_p1 = scmp.eq.s32.totalorder %s50_s23, 0  ;;  %p64_p2 = scmp.eq.s32.totalorder %s610_s0, 1 }
   0xe   : > { %p69_p3 = scmp.ne.s32.totalorder %s543_s17, %s539_s16  ;;  %p70_p4 = scmp.eq.s32.totalorder %s319_s20, 1 }
   0xf   : > { %s625_s24 = scalar_select %p51_p1, %s547_s18, %s53_s22  }
  0x10   : > { %p627_p5 = por %p64_p2, %p63_p0  ;;  %p631_p6 = por %p70_p4, %p69_p3 }
  0x11   : > { %p320_p7 = scmp.ge.s32.totalorder %s551_s19, 1  ;;  %p77_p8 = scmp.lt.s32.totalorder %s551_s19, 3 }
  0x12   : > { %p352_p9 = scmp.eq.s32.totalorder %s610_s0, 0  ;;  %s88_s29 = sshll.u32 %s717_s2, 4  ;;  %s89_s29 = int_to_ptr.hbm [resolvable:$true] %s88_s29 }
  0x13   : > { %p78_p10 = pnand %p320_p7, %p77_p8  ;;  %s562_s30 = smov [#allocation6]  }
  0x14   : > { %s90_s4 = sshll.u32 %s562_s30, 4  ;;  %s563_s5 = smov 128   ;;  %s91_s4 = int_to_ptr.vmem [resolvable:$true] %s90_s4 }
  0x15   : > { %p344_p11 = pneg %p78_p10  ;;  %s564_s6 = smov 8  }
  0x16   : > { %106 = sbr.rel (%p78_p10) target bundleno = 90 (0x5a), region = 24 }
  0x17   : > { %p345_p12 = pnand %p352_p9, %p344_p11 }
  0x19   : > { %347 = dma.hbm_to_vmem [thread:$0]  (!%p345_p12), %s89_s29, 256, %s91_s4, [#allocation7], %s563_s5, %s563_s5, %s564_s6  }
  0x1b   : > { %528 = dma.done.wait (%p352_p9), [#allocation7], 256  }
  0x1c   : > { %530 = vsyncadd (%p352_p9), [#allocation7], 4294967040  ;;  %s119_s7 = sand.u32 1, %s543_s17   ;;  %s653_s10 = smov 0  }
  0x1d   : > { %s650_s8 = sshll.u32 %s119_s7, 2 }
  0x1e   : > { %s121_s9 = scalar_lea.vmem [#allocation9], %s650_s8 }
  0x1f LB: >> { %s128_s11 = sshra.s32 %s555_s10, 7  ;;  %s133_s12 = sand.u32 127, %s555_s10  ;;  %s555_s10 = sphi %s653_s10, %s127_s10  }
  0x20   : >> { %s130_s13 = sadd.s32 %s610_s0, %s128_s11  ;;  %s137_s22 = scalar_lea.vmem [#allocation2], %s555_s10 }
  0x21   : >> { %s325_s14 = sshll.u32 %s130_s13, 7  ;;  %s662_s23 = sshll.u32 %s137_s22, 4  ;;  %s149_s23 = int_to_ptr.vmem [resolvable:$true] %s662_s23 }
  0x22   : >> { %s134_s15 = sadd.s32 %s325_s14, %s133_s12  ;;  %s138_s4 = scalar_lea.sflag [#allocation3], %s555_s10 }
  0x23   : >> { %s135_s20 = sld [smem:[#allocation5 + %s134_s15]]  ;;  %s453_s12 = scalar_lea.hbm %s716_s1, 256 }
  0x29   : >> { %s136_s29 = scalar_lea.hbm %s716_s1, %s135_s20 }
  0x2a   : >> { %s146_s30 = sshll.u32 %s136_s29, 4  ;;  %s147_s30 = int_to_ptr.hbm [resolvable:$true] %s146_s30 }
  0x2b   : >> { %s449_s5 = sshra.s32 %s147_s30, 4  ;;  %s450_s5 = int_to_ptr.hbm [resolvable:$true] %s449_s5 }
  0x2c   : >> { %s451_s6 = scalar_lea.hbm %s450_s5, 1  ;;  %p454_p0 = scmp.lt.s32.totalorder %s450_s5, %s716_s1 }
  0x2d   : >> { %p452_p13 = scmp.ne.s32.totalorder %s450_s5, %s451_s6  ;;  %p455_p1 = scmp.lt.s32.totalorder %s453_s12, %s451_s6 }
  0x2f   : >> { %p456_p2 = por %p455_p1, %p454_p0 }
  0x31   : >> { %p457_p3 = pnand %p456_p2, %p452_p13 }
  0x33   : >> { %460 = shalt.err (!%p457_p3)  }
  0x34   : >> { %s461_s20 = sshra.s32 %s149_s23, 4  ;;  %s565_s27 = smov [#allocation2]   ;;  %s462_s20 = int_to_ptr.vmem [resolvable:$true] %s461_s20 }
  0x35   : >> { %s463_s22 = scalar_lea.vmem %s462_s20, 1  ;;  %s465_s28 = scalar_lea.vmem %s565_s27, 8 }
  0x36   : >> { %p464_p4 = scmp.ne.s32.totalorder %s462_s20, %s463_s22  ;;  %p466_p7 = scmp.lt.s32.totalorder %s462_s20, [#allocation2] }
  0x37   : >> { %p467_p8 = scmp.lt.s32.totalorder %s465_s28, %s463_s22 }
  0x39   : >> { %p468_p9 = por %p467_p8, %p466_p7 }
  0x3b   : >> { %p469_p10 = pnand %p468_p9, %p464_p4 }
  0x3d   : >> { %472 = shalt.err (!%p469_p10)  }
  0x3e   : >> { %151 = dma.hbm_to_vmem [thread:$0]  %s147_s30, 16, %s149_s23, %s138_s4 }
  0x3f   : >> { %s127_s10 = sadd.s32 1, %s555_s10  }
  0x40   : >> { %p124_p11 = scmp.ge.s32.totalorder %s127_s10, 8  }
  0x41   : > { %s557_s29 = smov (%p124_p11), 0  }
  0x42   : > { %126 = sbr.rel (!%p124_p11) target bundleno = 31 (0x1f), region = 90 }
  0x47 LB: >> { %s166_s5 = scalar_lea.sflag [#allocation3], %s559_s29  ;;  %s559_s29 = sphi %s557_s29, %s157_s29  }
  0x48   : >> { %531 = dma.done.wait %s166_s5, 16 }
  0x49   : >> { %532 = vsyncadd %s166_s5, 4294967280  ;;  %s157_s29 = sadd.s32 1, %s559_s29  }
  0x4a   : >> { %p154_p12 = scmp.ge.s32.totalorder %s157_s29, 8  }
  0x4b   : > { %v170_v0 = vld [vmem:[#allocation2] sm:$0xff] (%p154_p12)  ;;  %v171_v1 = vld [vmem:[#allocation6] sm:$0xff] (%p154_p12)  ;;  %s327_s10 = sshll.u32 (%p154_p12), %s610_s0, 2  ;;  %s188_s6 = sshll.u32 (%p154_p12), %s121_s9, 4  ;;  %s189_s6 = int_to_ptr.vmem [resolvable:$true] %s188_s6 }
  0x4c   : > { %156 = sbr.rel (!%p154_p12) target bundleno = 71 (0x47), region = 101  ;;  %v172_v2 = vadd.f32 (%p154_p12), %v171_v1, %v170_v0  ;;  %s186_s4 = scalar_lea.hbm (%p154_p12), %s718_s3, %s327_s10 }
  0x4d   : > { %s190_s11 = sshll.u32 (%p154_p12), %s186_s4, 4  ;;  %s176_s13 = scalar_lea.sflag (%p154_p12), [#allocation8], %s119_s7  ;;  %s191_s11 = int_to_ptr.hbm [resolvable:$true] %s190_s11 }
  0x4e   : > { %v173_v3 = vpack.c.bf16 (%p154_p12), %v172_v2, %v172_v2  ;;  %s487_s12 = sshra.s32 (%p154_p12), %s191_s11, 4  ;;  %s493_s20 = scalar_lea.hbm (%p154_p12), %s718_s3, 8  ;;  %s488_s12 = int_to_ptr.hbm [resolvable:$true] %s487_s12 }
  0x4f   : > { %s489_s14 = scalar_lea.hbm (%p154_p12), %s488_s12, 4  ;;  %p494_p2 = scmp.lt.s32.totalorder (%p154_p12), %s488_s12, %s718_s3 }
  0x50   : > { %174 = vst [vmem:[%s121_s9] sm:$0xf] (%p154_p12), %v173_v3  ;;  %p490_p13 = scmp.ne.s32.totalorder (%p154_p12), %s488_s12, %s489_s14  ;;  %p495_p3 = scmp.lt.s32.totalorder (%p154_p12), %s493_s20, %s489_s14 }
  0x52   : > { %p491_p0 = pnand %p490_p13, %p627_p5  ;;  %p496_p4 = por %p495_p3, %p494_p2 }
  0x54   : > { %p492_p1 = pneg %p491_p0 }
  0x56   : > { %p497_p7 = pnand %p496_p4, %p492_p1 }
  0x58   : > { %500 = shalt.err (!%p497_p7)
}
  0x59   : > { %342 = dma.vmem_to_hbm [thread:$0]  (%p627_p5), %s189_s6, 64, %s191_s11, %s176_s13  }
  0x5a PF: > { %p354_p8 = scmp.ge.s32.totalorder %s551_s19, 2  ;;  %s202_s7 = sand.u32 1, %s539_s16  }
  0x5b   : > { %s203_s8 = scalar_lea.sflag [#allocation8], %s202_s7 }
  0x5c   : > { %p349_p9 = pnand %p354_p8, %p631_p6 }
  0x5e   : > { %p350_p10 = pneg %p349_p9 }
  0x60   : > { %534 = dma.done.wait (%p350_p10), %s203_s8, 64  }
  0x61   : > { %536 = vsyncadd (%p350_p10), %s203_s8, 4294967232  ;;  %p22_p11 = scmp.ge.s32.totalorder %s614_s21, 4   ;;  %s721_s16 = smov %s543_s17 }
  0x62   : > { %s722_s17 = smov %s547_s18  ;;  %s723_s18 = smov %s625_s24 }
  0x63   : > { %s724_s19 = smov %s614_s21  ;;  %24 = sbr.rel (!%p22_p11) target bundleno = 10 (0xa), region = 112 }
  0x68   :  { %209 = vsyncpa [#allocation7], 1 }
  0x69   :  { %211 = vsyncpa [#allocation7 + $0x1], 1 }
  0x6a   :  { %212 = vsyncpa [#allocation8], 1 }
  0x6b   :  { %214 = vsyncpa [#allocation8 + $0x1], 1 }
  0x6c   :  { %215 = vsyncmov [#allocation3] }
  0x6f   :  { %s216_s19 = vpop.sfrf %215 }
  0x70   :  { %p330_p5 = scmp.ne.s32.totalorder %s216_s19, 0 }
  0x72   :  { %220 = shalt.err (%p330_p5)  }
  0x73   :  { %222 = vsyncmov [#allocation3 + $0x1] }
  0x76   :  { %s223_s25 = vpop.sfrf %222 }
  0x77   :  { %p331_p6 = scmp.ne.s32.totalorder %s223_s25, 0 }
  0x79   :  { %227 = shalt.err (%p331_p6)  }
  0x7a   :  { %229 = vsyncmov [#allocation3 + $0x2] }
  0x7d   :  { %s230_s26 = vpop.sfrf %229 }
  0x7e   :  { %p332_p12 = scmp.ne.s32.totalorder %s230_s26, 0 }
  0x80   :  { %234 = shalt.err (%p332_p12)  }
  0x81   :  { %236 = vsyncmov [#allocation3 + $0x3] }
  0x84   :  { %s237_s24 = vpop.sfrf %236 }
  0x85   :  { %p333_p13 = scmp.ne.s32.totalorder %s237_s24, 0 }
  0x87   :  { %241 = shalt.err (%p333_p13)  }
  0x88   :  { %243 = vsyncmov [#allocation3 + $0x4] }
  0x8b   :  { %s244_s1 = vpop.sfrf %243 }
  0x8c   :  { %p334_p0 = scmp.ne.s32.totalorder %s244_s1, 0 }
  0x8e   :  { %248 = shalt.err (%p334_p0)  }
  0x8f   :  { %250 = vsyncmov [#allocation3 + $0x5] }
  0x92   :  { %s251_s2 = vpop.sfrf %250 }
  0x93   :  { %p335_p1 = scmp.ne.s32.totalorder %s251_s2, 0 }
  0x95   :  { %255 = shalt.err (%p335_p1)  }
  0x96   :  { %257 = vsyncmov [#allocation3 + $0x6] }
  0x99   :  { %s258_s3 = vpop.sfrf %257 }
  0x9a   :  { %p336_p2 = scmp.ne.s32.totalorder %s258_s3, 0 }
  0x9c   :  { %262 = shalt.err (%p336_p2)  }
  0x9d   :  { %264 = vsyncmov [#allocation3 + $0x7] }
  0xa0   :  { %s265_s16 = vpop.sfrf %264 }
  0xa1   :  { %p337_p3 = scmp.ne.s32.totalorder %s265_s16, 0 }
  0xa3   :  { %269 = shalt.err (%p337_p3)  }

</bundles_post_ra>
